<compile_context>
chip_gen: v6e
topology: v6e:2x2x1
jax: 0.10.0
libtpu: 0.0.40
codegen_flags: <defaults>
</compile_context>

<pallas_src>
import jax
import jax.numpy as jnp
from jax.experimental import pallas as pl
from jax.experimental.pallas import tpu as pltpu


def _round_up(x: int, m: int) -> int:
    return ((x + m - 1) // m) * m


def _cdiv(a: int, b: int) -> int:
    return (a + b - 1) // b


_K_CHUNK = 1024  # lane-multiple chunk for the in-kernel f32 reduction


def _make_kernel(K: int, k_chunk: int):
    def kernel(x_ref, w_ref, out_ref):
        # x_ref  : VMEM (block_b, K)  -- native dtype, upcast in-register only
        # w_ref  : VMEM (1, K)        -- f32, lane-major: exp(log_temps)*(W[1]-W[0])
        # out_ref: VMEM (block_b, 1)  -- f32 probabilities of class 1
        if K <= k_chunk:
            x = x_ref[...].astype(jnp.float32)
            z = jnp.sum(x * w_ref[...], axis=-1, keepdims=True)
        else:
            # Chunk the K reduction: bounds live f32 temporaries to
            # (block_b, k_chunk) instead of (block_b, K). Static Python loop
            # (K is static); chunk starts are 128-aligned.
            z = jnp.zeros((x_ref.shape[0], 1), jnp.float32)
            n_full = K // k_chunk
            for c in range(n_full):
                lo = c * k_chunk
                xs = x_ref[:, lo:lo + k_chunk].astype(jnp.float32)
                z = z + jnp.sum(xs * w_ref[:, lo:lo + k_chunk],
                                axis=-1, keepdims=True)
            rem = K - n_full * k_chunk
            if rem:
                lo = n_full * k_chunk
                xs = x_ref[:, lo:].astype(jnp.float32)
                z = z + jnp.sum(xs * w_ref[:, lo:], axis=-1, keepdims=True)
        # softmax(T*logits)[:,1] over 2 classes == sigmoid(z1 - z0) == 1/(1+exp(-z))
        out_ref[...] = (1.0 / (1.0 + jnp.exp(-z))).astype(out_ref.dtype)
    return kernel


def temperature_binomial_regression(X, W, log_temps, *, target_tile_bytes=4 << 20):
    """X: (B, K), W: (2, K), log_temps: scalar. Returns class-1 probs, shape (B,) f32."""
    B, K = X.shape
    assert W.shape == (2, K), W.shape

    # Fold the temperature into the class-difference weight vector (tiny O(K) prep).
    w_diff = jnp.exp(log_temps).astype(jnp.float32) * (
        W[1].astype(jnp.float32) - W[0].astype(jnp.float32))
    w_diff = w_diff.reshape(1, K)                                  # lane-major (1, K)

    itemsize = jnp.dtype(X.dtype).itemsize
    sublane = max(8, 32 // itemsize)          # 8 f32 / 16 bf16 / 32 int8-fp8

    # ---- generation-aware VMEM budget ---------------------------------------
    try:
        vmem_cap = int(pltpu.get_tpu_info().vmem_capacity_bytes)
    except Exception:  # pragma: no cover - conservative fallback
        vmem_cap = 64 << 20
    if vmem_cap >= (128 << 20):               # v5e / v6e: 128 MiB VMEM
        vmem_budget = 96 << 20
        vmem_clamp = 100 << 20
    else:                                     # v7x: 64 MiB per TC
        vmem_budget = 40 << 20
        vmem_clamp = 48 << 20

    k_chunk = min(K, _K_CHUNK)

    # Per-row VMEM: 2x double-buffered X row (native dtype) + ~2 f32 chunk
    # temporaries + output double buffer.
    per_row = 2 * K * itemsize + 2 * k_chunk * 4 + 2 * 4
    max_rows = max(sublane, (vmem_budget // per_row) // sublane * sublane)
    # TODO(synk): for extremely wide K the sublane-row floor can exceed the budget;
    #             a K-tiled grid with an accumulator would be needed then.

    # ---- byte-targeted batch tile -------------------------------------------
    block_b = max(sublane,
                  (int(target_tile_bytes) // max(1, K * itemsize))
                  // sublane * sublane)
    block_b = min(block_b, max_rows)

    # Guarantee >=2 tiles when the batch allows (v7x: keep both TCs busy).
    if B <= block_b and B > sublane:
        block_b = _round_up(_cdiv(B, 2), sublane)
    block_b = min(block_b, _round_up(B, sublane))
    block_b = max(block_b, sublane)

    n_tiles = _cdiv(B, block_b)               # ragged last block handled by Pallas

    vmem_need = (2 * block_b * K * itemsize            # double-buffered X tiles
                 + 2 * block_b * k_chunk * 4           # in-kernel f32 temporaries
                 + 2 * block_b * 4 + K * 4)            # out double-buffer + weight
    compiler_params = pltpu.CompilerParams(
        dimension_semantics=("parallel",),             # shard batch tiles across TCs
        vmem_limit_bytes=int(min(max(vmem_need + (8 << 20), 32 << 20), vmem_clamp)),
    )

    out = pl.pallas_call(
        _make_kernel(K, k_chunk),
        out_shape=jax.ShapeDtypeStruct((B, 1), jnp.float32),       # no batch padding
        grid=(n_tiles,),
        in_specs=[
            pl.BlockSpec((block_b, K), lambda i: (i, 0)),          # X tile, native dtype
            pl.BlockSpec((1, K), lambda i: (0, 0)),                # lane-major weight
        ],
        out_specs=pl.BlockSpec((block_b, 1), lambda i: (i, 0)),
        compiler_params=compiler_params,
    )(X, w_diff)

    return out.reshape(-1)


if __name__ == "__main__":
    key = jax.random.PRNGKey(0)
    kx, kw, kx2 = jax.random.split(key, 3)

    batch, num_inputs = 16, 32
    X = jax.random.normal(kx, (batch, num_inputs), dtype=jnp.float32)
    # Deterministic synthetic stand-in for the two selected rows of last_layer_<model>.pth
    W = jax.random.normal(kw, (2, num_inputs), dtype=jnp.float32)
    log_temps = jnp.array(1.0, dtype=jnp.float32)    # nn.Parameter(torch.ones([]))

    probs = temperature_binomial_regression(X, W, log_temps)
    probs = jax.block_until_ready(probs)

    # Reference mirrors the PyTorch forward; HIGHEST precision so the reference
    # matmul itself is not the source of error.
    def reference(X_, W_, lt_):
        logits = jnp.exp(lt_) * jnp.matmul(X_, W_.T, precision=jax.lax.Precision.HIGHEST)
        return jax.nn.softmax(logits, axis=-1)[:, 1]

    ref = reference(X, W, log_temps)
    assert probs.shape == (batch,)
    assert jnp.allclose(probs, ref, atol=1e-5, rtol=1e-5), float(
        jnp.max(jnp.abs(probs - ref)))

    # Second check: batch not divisible by the tile (exercises the ragged last
    # block path -- no jnp.pad anywhere).
    X2 = jax.random.normal(kx2, (13, num_inputs), dtype=jnp.float32)
    probs2 = jax.block_until_ready(temperature_binomial_regression(X2, W, log_temps))
    ref2 = reference(X2, W, log_temps)
    assert probs2.shape == (13,)
    assert jnp.allclose(probs2, ref2, atol=1e-5, rtol=1e-5)

    print("KERNEL_OK")
</pallas_src>

<mosaic_0001>
module attributes {stable_mosaic.version = 11 : i64} {
  func.func @kernel(%arg0: i32, %arg1: memref<8x32xf32, #tpu.memory_space<vmem>>, %arg2: memref<1x32xf32, #tpu.memory_space<vmem>>, %arg3: memref<8x1xf32, #tpu.memory_space<vmem>>) attributes {dimension_semantics = [#tpu.dimension_semantics<parallel>], iteration_bounds = array<i64: 2>, scalar_prefetch = 0 : i64, scratch_operands = 0 : i64, tpu.core_type = #tpu.core_type<tc>, window_params = [{transform_indices = @transform_0, window_bounds = array<i64: 8, 32>}, {pipeline_mode = #tpu.pipeline_mode<synchronous>, transform_indices = @transform_1, window_bounds = array<i64: 1, 32>}, {transform_indices = @transform_2, window_bounds = array<i64: 8, 1>}]} {
    %c0 = arith.constant 0 : index
    %c0_0 = arith.constant 0 : index
    %0 = vector.load %arg1[%c0, %c0_0] : memref<8x32xf32, #tpu.memory_space<vmem>>, vector<8x32xf32>
    %c0_1 = arith.constant 0 : index
    %c0_2 = arith.constant 0 : index
    %1 = vector.load %arg2[%c0_1, %c0_2] : memref<1x32xf32, #tpu.memory_space<vmem>>, vector<1x32xf32>
    %2 = vector.broadcast %1 : vector<1x32xf32> to vector<8x32xf32>
    %3 = arith.mulf %0, %2 : vector<8x32xf32>
    %cst = arith.constant dense<0.000000e+00> : vector<8xf32>
    %4 = vector.multi_reduction <add>, %3, %cst [1] : vector<8x32xf32> to vector<8xf32>
    %5 = vector.shape_cast %4 : vector<8xf32> to vector<8x1xf32>
    %cst_3 = arith.constant 0.000000e+00 : f32
    %6 = vector.broadcast %cst_3 : f32 to vector<8x1xf32>
    %7 = arith.subf %6, %5 : vector<8x1xf32>
    %8 = math.exp %7 : vector<8x1xf32>
    %cst_4 = arith.constant 1.000000e+00 : f32
    %9 = vector.broadcast %cst_4 : f32 to vector<8x1xf32>
    %10 = arith.addf %9, %8 : vector<8x1xf32>
    %cst_5 = arith.constant 1.000000e+00 : f32
    %11 = vector.broadcast %cst_5 : f32 to vector<8x1xf32>
    %12 = arith.divf %11, %10 : vector<8x1xf32>
    %c0_6 = arith.constant 0 : index
    %c0_7 = arith.constant 0 : index
    %13 = vector.load %arg3[%c0_6, %c0_7] : memref<8x1xf32, #tpu.memory_space<vmem>>, vector<8x1xf32>
    tpu.vector_store %arg3[%c0_6, %c0_7], %12 {strides = array<i32>} : memref<8x1xf32, #tpu.memory_space<vmem>>, vector<8x1xf32>,
    return
  }
  func.func @transform_0(%arg0: i32) -> (i32, i32) {
    %c0_i32 = arith.constant 0 : i32
    %c0_i32_0 = arith.constant 0 : i32
    return %arg0, %c0_i32 : i32, i32
  }
  func.func @transform_1(%arg0: i32) -> (i32, i32) {
    %c0_i32 = arith.constant 0 : i32
    %c0_i32_0 = arith.constant 0 : i32
    %c0_i32_1 = arith.constant 0 : i32
    return %c0_i32, %c0_i32_0 : i32, i32
  }
  func.func @transform_2(%arg0: i32) -> (i32, i32) {
    %c0_i32 = arith.constant 0 : i32
    %c0_i32_0 = arith.constant 0 : i32
    return %arg0, %c0_i32 : i32, i32
  }
}

</mosaic_0001>

<bundles_post_ra>
// kernel: tpu_custom_call.1
= control target key start
LH: loop header
LB: loop body
LE: loop exit
PB: predicated region body
PF: predicated region fallthrough
CT: control target
= control target key end

     0   :  { %7 = vsyncpa [#allocation3], 0  ;;  %s482_s0 = inlined_call_operand.hbm [shape: f32[16,32], index: 0, kind: input, shape index: {}]   ;;  %s483_s1 = inlined_call_operand.vmem [shape: f32[1,32], index: 1, kind: input, shape index: {}]   ;;  %s484_s2 = inlined_call_operand.vmem [shape: f32[16,1], index: 2, kind: output, shape index: {}]  }
   0x1   :  { %9 = vsyncpa [#allocation3 + $0x1], 0  ;;  %s379_s9 = smov 0   ;;  %s381_s10 = smov 0  }
   0x2   :  { %s383_s11 = smov 0   ;;  %s385_s12 = smov 0  }
   0x3 LB: > { %s398_s13 = sadd.s32 4294967295, %s361_s12   ;;  %s401_s14 = sadd.s32 1, %s361_s12   ;;  %s361_s12 = sphi %s385_s12, %s494_s12   ;;  %s357_s11 = sphi %s383_s11, %s493_s11   ;;  %s353_s10 = sphi %s381_s10, %s492_s10   ;;  %s349_s9 = sphi %s379_s9, %s491_s9  }
   0x4   : > { %s19_s15 = ssub.s32 %s361_s12, %s401_s14  ;;  %s22_s16 = sadd.s32 1, %s357_s11 }
   0x5   : > { %p20_p0 = scmp.eq.s32.totalorder %s19_s15, 0  ;;  %p29_p1 = scmp.ne.s32.totalorder %s357_s11, %s353_s10 }
   0x6   : > { %p30_p2 = scmp.eq.s32.totalorder %s361_s12, 0  ;;  %p35_p3 = scmp.ne.s32.totalorder %s353_s10, %s349_s9 }
   0x7   : > { %s411_s17 = scalar_select %p20_p0, %s357_s11, %s22_s16  }
   0x8   : > { %p31_p4 = por %p30_p2, %p29_p1  ;;  %p36_p5 = scmp.eq.s32.totalorder %s398_s13, 0 }
   0x9   : > { %p262_p6 = scmp.lt.s32.totalorder %s361_s12, 2  ;;  %s109_s19 = sand.u32 1, %s357_s11  }
   0xa   : > { %p415_p7 = por %p36_p5, %p35_p3  ;;  %s248_s20 = sshll.u32 %s109_s19, 3 }
   0xb   : > { %s249_s21 = sshll.u32 %s361_s12, 7  ;;  %s113_s25 = scalar_lea.vmem [#allocation2], %s248_s20 }
   0xc   : > { %s486_s18 = scalar_select %p415_p7, 1, 0 }
   0xd   : > { %s424_s24 = scalar_lea.hbm %s482_s0, %s249_s21  ;;  %s120_s26 = sshll.u32 %s113_s25, 4  ;;  %s426_s26 = int_to_ptr.vmem [resolvable:$true] %s120_s26 }
   0xe   : > { %p428_p8 = pnand %p262_p6, %p31_p4  ;;  %s110_s28 = scalar_lea.sflag [#allocation3], %s109_s19 }
   0xf   : > { %s299_s29 = scalar_lea.hbm %s424_s24, 128  ;;  %s304_s4 = scalar_lea.hbm %s482_s0, 256 }
  0x10   : > { %p300_p11 = scmp.ne.s32.totalorder %s424_s24, %s299_s29  ;;  %p301_p12 = pneg %p428_p8 }
  0x11   : > { %p305_p1 = scmp.lt.s32.totalorder %s424_s24, %s482_s0  ;;  %p306_p2 = scmp.lt.s32.totalorder %s304_s4, %s299_s29 }
  0x12   : > { %p302_p13 = pnand %p301_p12, %p300_p11 }
  0x13   : > { %p307_p3 = por %p306_p2, %p305_p1 }
  0x14   : > { %p303_p0 = pneg %p302_p13 }
  0x16   : > { %p308_p4 = pnand %p307_p3, %p303_p0 }
  0x18   : > { %311 = shalt.err (!%p308_p4)
}
  0x19   : > { %s312_s7 = scalar_lea.vmem %s426_s26, 128  ;;  %s363_s8 = smov [#allocation2]  }
  0x1a   : > { %p313_p5 = scmp.ne.s32.totalorder %s426_s26, %s312_s7  ;;  %s317_s9 = sshll.u32 %s363_s8, 4  ;;  %s318_s9 = int_to_ptr.vmem [resolvable:$false] %s317_s9 }
  0x1b   : > { %s319_s15 = scalar_lea.vmem %s318_s9, 256  ;;  %p320_p13 = scmp.lt.s32.totalorder %s426_s26, %s318_s9 }
  0x1c   : > { %p315_p6 = pnand %p313_p5, %p301_p12  ;;  %p321_p9 = scmp.lt.s32.totalorder %s319_s15, %s312_s7 }
  0x1e   : > { %p316_p11 = pneg %p315_p6  ;;  %p322_p10 = por %p321_p9, %p320_p13 }
  0x20   : > { %p323_p7 = pnand %p322_p10, %p316_p11 }
  0x22   : > { %326 = shalt.err (!%p323_p7)
}
  0x23   : > { %261 = dma.hbm_to_vmem [thread:$0]  (!%p428_p8), %s424_s24, 128, %s426_s26, %s110_s28  }
  0x24   : > { %p488_p0 = scmp.lt.s32.totalorder %s361_s12, 3  ;;  %p489_p1 = scmp.ge.s32.totalorder %s361_s12, 1 }
  0x26   : > { %p126_p12 = pnand %p489_p1, %p488_p0 }
  0x27   : > { %s131_s16 = sand.u32 (!%p126_p12), 1, %s353_s10   ;;  %p490_p9 = scmp.ne.s32.totalorder (!%p126_p12), %s486_s18, 0 }
  0x28   : > { %129 = sbr.rel (%p126_p12) target bundleno = 224 (0xe0), region = 28  ;;  %s251_s19 = sshll.u32 (!%p126_p12), %s131_s16, 3 }
  0x29   : > { %s132_s20 = scalar_lea.sflag (!%p126_p12), [#allocation3], %s131_s16  ;;  %s135_s21 = scalar_lea.vmem (!%p126_p12), [#allocation2], %s251_s19 }
  0x2d   : > { %344 = dma.done.wait (%p490_p9), %s132_s20, 128  }
  0x2e   : > { %346 = vsyncadd (%p490_p9), %s132_s20, 4294967168  ;;  %v159_v0 = vld [vmem:[%s135_s21] sm:$0xff]  ;;  %vm168_vm0 = vcmask 261120   ;;  %p155_p7 = scmp.lt.s32.totalorder %s398_s13, 1  ;;  %vm178_vm1 = vcmask 7168  }
  0x2f   : > { %v253_v1 = vld [vmem:[%s483_s1] ss:$0 sm:$0xff] }
  0x30   : > { %v167_v2 = vmul.f32 %v253_v1, %v159_v0  ;;  %s496_s13 = smov (!%p155_p7, %s398_s13), 1 }
  0x31   : > { %s252_s12 = sshll.u32 %s496_s13, 3 }
  0x32   : > { %v169_v3 = vsel %vm168_vm0, %v167_v2, 0.0  ;;  %s158_s25 = scalar_lea.vmem %s484_s2, %s252_s12 }
  0x33   : > { %170 = vadd.xlane.f32.xlu0 %v169_v3 }
  0xbc   : > { %v171_v4 = vpop.xlane.xlu0 %170 }
  0xbd   : > { %v172_v5 = vsub.f32 0.0, %v171_v4 }
  0xbf   : > { %v173_v6 = vmul.f32 1.442695, %v172_v5 }
  0xc1   : > { %295 = vpow2.f32 %v173_v6 }
  0xce   : > { %v296_v7 = vpop.eup %295 }
  0xcf   : > { %v175_v8 = vadd.f32 1.0, %v296_v7 }
  0xd1   : > { %297 = vrcp.f32 %v175_v8 }
  0xde   : > { %v298_v9 = vpop.eup %297 }
  0xdf   : > { %179 = vst.msk [vmem:[%s158_s25] sm:$0xff] %vm178_vm1, %v298_v9 }
  0xe0 PF: > { %p12_p8 = scmp.ge.s32.totalorder %s401_s14, 4   ;;  %s491_s9 = smov %s353_s10 }
  0xe1   : > { %s492_s10 = smov %s357_s11  ;;  %s493_s11 = smov %s411_s17 }
  0xe2   : > { %s494_s12 = smov %s401_s14  ;;  %14 = sbr.rel (!%p12_p8) target bundleno = 3 (0x3), region = 68 }
  0xe7   :  { %199 = vsyncpa [#allocation3], 1 }
  0xe8   :  { %201 = vsyncpa [#allocation3 + $0x1], 1 }

</bundles_post_ra>
